<compile_context>
chip_gen: v6e
topology: v6e:2x2x1
jax: 0.10.0
libtpu: 0.0.40
codegen_flags: <defaults>
</compile_context>

<pallas_src>
import functools

import jax
import jax.numpy as jnp
import numpy as np
from jax.experimental import pallas as pl
from jax.experimental.pallas import tpu as pltpu

LANE = 128
DEFAULT_TILE_ROWS = 2048   # (2048, 128) f32 block = 1 MiB


def _sublane_multiple(dtype) -> int:
    """Required sublane multiple for a dtype's native TPU tiling."""
    return {4: 8, 2: 16, 1: 32}.get(jnp.dtype(dtype).itemsize, 8)


def _ceil_to(x: int, m: int) -> int:
    return ((x + m - 1) // m) * m


def _dice_kernel(x_ref, t_ref, o_ref, acc_xt, acc_xx, acc_tt, *,
                 n_rows, block_rows, need_mask, smooth):
    i = pl.program_id(0)

    @pl.when(i == 0)
    def _init():
        acc_xt[...] = jnp.zeros_like(acc_xt)
        acc_xx[...] = jnp.zeros_like(acc_xx)
        acc_tt[...] = jnp.zeros_like(acc_tt)

    x = x_ref[...].astype(jnp.float32)
    t = t_ref[...].astype(jnp.float32)

    if need_mask:  # static Python bool: only traced when the last block is ragged
        row = jax.lax.broadcasted_iota(jnp.int32, x.shape, 0) + i * block_rows
        valid = row < n_rows
        x = jnp.where(valid, x, 0.0)
        t = jnp.where(valid, t, 0.0)

    # (block_rows, 128) -> (block_rows//8, 8, 128): free sublane-split view.
    # Reducing axis 0 lowers to plain vreg adds (VPU), keeping the hot loop
    # free of cross-lane reductions and scalar SMEM read-modify-write chains.
    xs = x.reshape(block_rows // 8, 8, LANE)
    ts = t.reshape(block_rows // 8, 8, LANE)
    acc_xt[...] += jnp.sum(xs * ts, axis=0)   # intersection partials
    acc_xx[...] += jnp.sum(xs * xs, axis=0)   # A_sum partials
    acc_tt[...] += jnp.sum(ts * ts, axis=0)   # B_sum partials

    @pl.when(i == pl.num_programs(0) - 1)
    def _finalize():
        inter = jnp.sum(acc_xt[...])
        a_sum = jnp.sum(acc_xx[...])
        b_sum = jnp.sum(acc_tt[...])
        o_ref[0] = 1.0 - (2.0 * inter + smooth) / (a_sum + b_sum + smooth)


def dice_loss(pred, target, *, tile_rows=DEFAULT_TILE_ROWS, smooth=1.0):
    """Pallas DiceLoss: 1 - (2*sum(p*t)+1) / (sum(p*p)+sum(t*t)+1)."""
    x = pred.reshape(-1)       # keep original dtype; cast happens in-kernel
    t = target.reshape(-1)
    n = x.shape[0]
    if n == 0:
        # Empty input: intersection = A_sum = B_sum = 0  ->  loss = 0.
        return jnp.float32(1.0 - smooth / smooth)

    # Only a <128-element pad when numel is not a multiple of 128 (rare);
    # padded zeros do not perturb any of the three sums of products.
    lane_pad = (-n) % LANE
    if lane_pad:
        x = jnp.pad(x, (0, lane_pad))
        t = jnp.pad(t, (0, lane_pad))
    n_rows = (n + lane_pad) // LANE
    x2 = x.reshape(n_rows, LANE)   # free reshape of a contiguous flat array
    t2 = t.reshape(n_rows, LANE)

    mult = max(_sublane_multiple(x2.dtype), _sublane_multiple(t2.dtype))
    tile_rows = max(mult, (tile_rows // mult) * mult)
    block_rows = min(tile_rows, _ceil_to(n_rows, mult))
    num_tiles = -(-n_rows // block_rows)
    need_mask = (n_rows % block_rows) != 0   # ragged last block -> mask rows

    kernel = functools.partial(
        _dice_kernel,
        n_rows=n_rows,
        block_rows=block_rows,
        need_mask=need_mask,
        smooth=float(smooth),
    )

    out = pl.pallas_call(
        kernel,
        out_shape=jax.ShapeDtypeStruct((1,), jnp.float32),
        grid_spec=pltpu.PrefetchScalarGridSpec(
            num_scalar_prefetch=0,
            grid=(num_tiles,),
            in_specs=[
                pl.BlockSpec((block_rows, LANE), lambda i: (i, 0)),
                pl.BlockSpec((block_rows, LANE), lambda i: (i, 0)),
            ],
            out_specs=pl.BlockSpec(memory_space=pltpu.SMEM),
            scratch_shapes=[
                pltpu.VMEM((8, LANE), jnp.float32),   # sum(x*t) per lane
                pltpu.VMEM((8, LANE), jnp.float32),   # sum(x*x) per lane
                pltpu.VMEM((8, LANE), jnp.float32),   # sum(t*t) per lane
            ],
        ),
        compiler_params=pltpu.CompilerParams(
            dimension_semantics=("arbitrary",),       # sequential reduction axis
            vmem_limit_bytes=32 * 1024 * 1024,
        ),
    )(x2, t2)
    # TODO(synk): on v7x, shard the reduction grid across both TensorCores
    # (leading "parallel" axis + per-core partial sums combined here).
    return out[0]


def dice_loss_ref(pred, target):
    smooth = 1.0
    iflat = pred.reshape(-1).astype(jnp.float32)
    tflat = target.reshape(-1).astype(jnp.float32)
    inter = jnp.sum(iflat * tflat)
    a = jnp.sum(iflat * iflat)
    b = jnp.sum(tflat * tflat)
    return 1.0 - (2.0 * inter + smooth) / (a + b + smooth)


if __name__ == "__main__":
    key = jax.random.PRNGKey(0)
    k1, k2 = jax.random.split(key)

    # Small shapes consistent with a segmentation forward pass (NCHW).
    pred = jax.random.uniform(k1, (2, 4, 16, 16), dtype=jnp.float32)              # sigmoid-like probs
    target = (jax.random.uniform(k2, (2, 4, 16, 16)) > 0.5).astype(jnp.float32)   # binary mask

    loss = dice_loss(pred, target)
    loss = jax.block_until_ready(loss)

    ref = jax.block_until_ready(dice_loss_ref(pred, target))
    np.testing.assert_allclose(np.asarray(loss), np.asarray(ref), rtol=1e-5, atol=1e-6)

    print("KERNEL_OK")
</pallas_src>

<mosaic_0001>
module attributes {stable_mosaic.version = 11 : i64} {
  func.func @_dice_kernel(%arg0: i32, %arg1: memref<16x128xf32, #tpu.memory_space<vmem>>, %arg2: memref<16x128xf32, #tpu.memory_space<vmem>>, %arg3: memref<1xf32, #tpu.memory_space<smem>>, %arg4: memref<8x128xf32, #tpu.memory_space<vmem>>, %arg5: memref<8x128xf32, #tpu.memory_space<vmem>>, %arg6: memref<8x128xf32, #tpu.memory_space<vmem>>) attributes {dimension_semantics = [#tpu.dimension_semantics<arbitrary>], iteration_bounds = array<i64: 1>, scalar_prefetch = 0 : i64, scratch_operands = 3 : i64, tpu.core_type = #tpu.core_type<tc>, window_params = [{transform_indices = @transform_0, window_bounds = array<i64: 16, 128>}, {transform_indices = @transform_1, window_bounds = array<i64: 16, 128>}, {transform_indices = @transform_2, window_bounds = array<i64: 1>}]} {
    %c0_i32 = arith.constant 0 : i32
    %0 = arith.cmpi eq, %arg0, %c0_i32 : i32
    %1 = arith.extui %0 : i1 to i32
    %c0_i32_0 = arith.constant 0 : i32
    %2 = arith.cmpi ne, %1, %c0_i32_0 : i32
    scf.if %2 {
      %cst_20 = arith.constant 0.000000e+00 : f32
      %25 = vector.broadcast %cst_20 : f32 to vector<8x128xf32>
      %c0_21 = arith.constant 0 : index
      %c0_22 = arith.constant 0 : index
      %26 = vector.load %arg4[%c0_21, %c0_22] : memref<8x128xf32, #tpu.memory_space<vmem>>, vector<8x128xf32>
      tpu.vector_store %arg4[%c0_21, %c0_22], %25 {strides = array<i32>} : memref<8x128xf32, #tpu.memory_space<vmem>>, vector<8x128xf32>,
      %cst_23 = arith.constant 0.000000e+00 : f32
      %27 = vector.broadcast %cst_23 : f32 to vector<8x128xf32>
      %c0_24 = arith.constant 0 : index
      %c0_25 = arith.constant 0 : index
      %28 = vector.load %arg5[%c0_24, %c0_25] : memref<8x128xf32, #tpu.memory_space<vmem>>, vector<8x128xf32>
      tpu.vector_store %arg5[%c0_24, %c0_25], %27 {strides = array<i32>} : memref<8x128xf32, #tpu.memory_space<vmem>>, vector<8x128xf32>,
      %cst_26 = arith.constant 0.000000e+00 : f32
      %29 = vector.broadcast %cst_26 : f32 to vector<8x128xf32>
      %c0_27 = arith.constant 0 : index
      %c0_28 = arith.constant 0 : index
      %30 = vector.load %arg6[%c0_27, %c0_28] : memref<8x128xf32, #tpu.memory_space<vmem>>, vector<8x128xf32>
      tpu.vector_store %arg6[%c0_27, %c0_28], %29 {strides = array<i32>} : memref<8x128xf32, #tpu.memory_space<vmem>>, vector<8x128xf32>,
    } else {
    }
    %c0 = arith.constant 0 : index
    %c0_1 = arith.constant 0 : index
    %3 = vector.load %arg1[%c0, %c0_1] : memref<16x128xf32, #tpu.memory_space<vmem>>, vector<16x128xf32>
    %c0_2 = arith.constant 0 : index
    %c0_3 = arith.constant 0 : index
    %4 = vector.load %arg2[%c0_2, %c0_3] : memref<16x128xf32, #tpu.memory_space<vmem>>, vector<16x128xf32>
    %5 = vector.shape_cast %3 : vector<16x128xf32> to vector<2x8x128xf32>
    %6 = vector.shape_cast %4 : vector<16x128xf32> to vector<2x8x128xf32>
    %c0_4 = arith.constant 0 : index
    %c0_5 = arith.constant 0 : index
    %7 = vector.load %arg4[%c0_4, %c0_5] : memref<8x128xf32, #tpu.memory_space<vmem>>, vector<8x128xf32>
    %8 = arith.mulf %5, %6 : vector<2x8x128xf32>
    %cst = arith.constant dense<0.000000e+00> : vector<8x128xf32>
    %9 = vector.multi_reduction <add>, %8, %cst [0] : vector<2x8x128xf32> to vector<8x128xf32>
    %10 = arith.addf %7, %9 : vector<8x128xf32>
    %c0_6 = arith.constant 0 : index
    %c0_7 = arith.constant 0 : index
    %11 = vector.load %arg4[%c0_6, %c0_7] : memref<8x128xf32, #tpu.memory_space<vmem>>, vector<8x128xf32>
    tpu.vector_store %arg4[%c0_6, %c0_7], %10 {strides = array<i32>} : memref<8x128xf32, #tpu.memory_space<vmem>>, vector<8x128xf32>,
    %c0_8 = arith.constant 0 : index
    %c0_9 = arith.constant 0 : index
    %12 = vector.load %arg5[%c0_8, %c0_9] : memref<8x128xf32, #tpu.memory_space<vmem>>, vector<8x128xf32>
    %13 = arith.mulf %5, %5 : vector<2x8x128xf32>
    %cst_10 = arith.constant dense<0.000000e+00> : vector<8x128xf32>
    %14 = vector.multi_reduction <add>, %13, %cst_10 [0] : vector<2x8x128xf32> to vector<8x128xf32>
    %15 = arith.addf %12, %14 : vector<8x128xf32>
    %c0_11 = arith.constant 0 : index
    %c0_12 = arith.constant 0 : index
    %16 = vector.load %arg5[%c0_11, %c0_12] : memref<8x128xf32, #tpu.memory_space<vmem>>, vector<8x128xf32>
    tpu.vector_store %arg5[%c0_11, %c0_12], %15 {strides = array<i32>} : memref<8x128xf32, #tpu.memory_space<vmem>>, vector<8x128xf32>,
    %c0_13 = arith.constant 0 : index
    %c0_14 = arith.constant 0 : index
    %17 = vector.load %arg6[%c0_13, %c0_14] : memref<8x128xf32, #tpu.memory_space<vmem>>, vector<8x128xf32>
    %18 = arith.mulf %6, %6 : vector<2x8x128xf32>
    %cst_15 = arith.constant dense<0.000000e+00> : vector<8x128xf32>
    %19 = vector.multi_reduction <add>, %18, %cst_15 [0] : vector<2x8x128xf32> to vector<8x128xf32>
    %20 = arith.addf %17, %19 : vector<8x128xf32>
    %c0_16 = arith.constant 0 : index
    %c0_17 = arith.constant 0 : index
    %21 = vector.load %arg6[%c0_16, %c0_17] : memref<8x128xf32, #tpu.memory_space<vmem>>, vector<8x128xf32>
    tpu.vector_store %arg6[%c0_16, %c0_17], %20 {strides = array<i32>} : memref<8x128xf32, #tpu.memory_space<vmem>>, vector<8x128xf32>,
    %c0_i32_18 = arith.constant 0 : i32
    %22 = arith.cmpi eq, %arg0, %c0_i32_18 : i32
    %23 = arith.extui %22 : i1 to i32
    %c0_i32_19 = arith.constant 0 : i32
    %24 = arith.cmpi ne, %23, %c0_i32_19 : i32
    scf.if %24 {
      %c0_20 = arith.constant 0 : index
      %c0_21 = arith.constant 0 : index
      %25 = vector.load %arg4[%c0_20, %c0_21] : memref<8x128xf32, #tpu.memory_space<vmem>>, vector<8x128xf32>
      %26 = vector.shape_cast %25 : vector<8x128xf32> to vector<1x8x128xf32>
      %cst_22 = arith.constant dense<0.000000e+00> : vector<1xf32>
      %27 = vector.multi_reduction <add>, %26, %cst_22 [1, 2] : vector<1x8x128xf32> to vector<1xf32>
      %28 = vector.shape_cast %27 : vector<1xf32> to vector<1x1x1xf32>
      %29 = vector.extract %28[0, 0, 0] : f32 from vector<1x1x1xf32>
      %c0_23 = arith.constant 0 : index
      %c0_24 = arith.constant 0 : index
      %30 = vector.load %arg5[%c0_23, %c0_24] : memref<8x128xf32, #tpu.memory_space<vmem>>, vector<8x128xf32>
      %31 = vector.shape_cast %30 : vector<8x128xf32> to vector<1x8x128xf32>
      %cst_25 = arith.constant dense<0.000000e+00> : vector<1xf32>
      %32 = vector.multi_reduction <add>, %31, %cst_25 [1, 2] : vector<1x8x128xf32> to vector<1xf32>
      %33 = vector.shape_cast %32 : vector<1xf32> to vector<1x1x1xf32>
      %34 = vector.extract %33[0, 0, 0] : f32 from vector<1x1x1xf32>
      %c0_26 = arith.constant 0 : index
      %c0_27 = arith.constant 0 : index
      %35 = vector.load %arg6[%c0_26, %c0_27] : memref<8x128xf32, #tpu.memory_space<vmem>>, vector<8x128xf32>
      %36 = vector.shape_cast %35 : vector<8x128xf32> to vector<1x8x128xf32>
      %cst_28 = arith.constant dense<0.000000e+00> : vector<1xf32>
      %37 = vector.multi_reduction <add>, %36, %cst_28 [1, 2] : vector<1x8x128xf32> to vector<1xf32>
      %38 = vector.shape_cast %37 : vector<1xf32> to vector<1x1x1xf32>
      %39 = vector.extract %38[0, 0, 0] : f32 from vector<1x1x1xf32>
      %cst_29 = arith.constant 2.000000e+00 : f32
      %40 = arith.mulf %cst_29, %29 : f32
      %cst_30 = arith.constant 1.000000e+00 : f32
      %41 = arith.addf %40, %cst_30 : f32
      %42 = arith.addf %34, %39 : f32
      %cst_31 = arith.constant 1.000000e+00 : f32
      %43 = arith.addf %42, %cst_31 : f32
      %44 = arith.divf %41, %43 : f32
      %cst_32 = arith.constant 1.000000e+00 : f32
      %45 = arith.subf %cst_32, %44 : f32
      %c0_33 = arith.constant 0 : index
      %46 = memref.load %arg3[%c0_33] : memref<1xf32, #tpu.memory_space<smem>>
      memref.store %45, %arg3[%c0_33] : memref<1xf32, #tpu.memory_space<smem>>
    } else {
    }
    return
  }
  func.func @transform_0(%arg0: i32) -> (i32, i32) {
    %c0_i32 = arith.constant 0 : i32
    %c0_i32_0 = arith.constant 0 : i32
    return %arg0, %c0_i32 : i32, i32
  }
  func.func @transform_1(%arg0: i32) -> (i32, i32) {
    %c0_i32 = arith.constant 0 : i32
    %c0_i32_0 = arith.constant 0 : i32
    return %arg0, %c0_i32 : i32, i32
  }
  func.func @transform_2(%arg0: i32) -> i32 {
    %c0_i32 = arith.constant 0 : i32
    %c0_i32_0 = arith.constant 0 : i32
    return %c0_i32 : i32
  }
}

</mosaic_0001>

<bundles_post_ra>
// kernel: tpu_custom_call.1
= control target key start
LH: loop header
LB: loop body
LE: loop exit
PB: predicated region body
PF: predicated region fallthrough
CT: control target
= control target key end

     0   :  { %7 = vsyncpa [#allocation6], 0  ;;  %s226_s0 = inlined_call_operand.hbm [shape: f32[16,128], index: 0, kind: input, shape index: {}]   ;;  %s227_s1 = inlined_call_operand.hbm [shape: f32[16,128], index: 1, kind: input, shape index: {}]   ;;  %s228_s2 = inlined_call_operand.hbm [shape: f32[1], index: 2, kind: output, shape index: {}]  }
   0x1   :  { %8 = vsyncpa [#allocation9], 0 }
   0x2   :  { %9 = vsyncpa [#allocation7], 0  ;;  %s197_s9 = smov [#allocation5]  }
   0x3   :  { %s15_s10 = sshll.u32 %s197_s9, 4  ;;  %s16_s10 = int_to_ptr.vmem [resolvable:$true] %s15_s10 }
   0x4   :  { %s151_s11 = scalar_lea.vmem %s16_s10, 256  ;;  %p156_p1 = scmp.lt.s32.totalorder %s16_s10, %s16_s10 }
   0x5   :  { %p152_p0 = scmp.ne.s32.totalorder %s16_s10, %s151_s11  ;;  %p157_p2 = scmp.lt.s32.totalorder %s151_s11, %s151_s11 }
   0x7   :  { %p158_p3 = por %p157_p2, %p156_p1 }
   0x9   :  { %p159_p4 = pnand %p158_p3, %p152_p0 }
   0xb   :  { %162 = shalt.err (!%p159_p4)
}
   0xc   :  { %s198_s12 = smov 128   ;;  %s199_s13 = smov 8  }
   0xd   :  { %21 = dma.hbm_to_vmem [thread:$0]  %s226_s0, 256, %s16_s10, [#allocation6], %s198_s12, %s198_s12, %s199_s13  }
   0xe   :  { %s200_s16 = smov [#allocation8]  }
   0xf   :  { %s27_s17 = sshll.u32 %s200_s16, 4  ;;  %s28_s17 = int_to_ptr.vmem [resolvable:$true] %s27_s17 }
  0x10   :  { %s171_s18 = scalar_lea.vmem %s28_s17, 256  ;;  %p176_p6 = scmp.lt.s32.totalorder %s28_s17, %s28_s17 }
  0x11   :  { %p172_p5 = scmp.ne.s32.totalorder %s28_s17, %s171_s18  ;;  %p177_p7 = scmp.lt.s32.totalorder %s171_s18, %s171_s18 }
  0x13   :  { %p178_p8 = por %p177_p7, %p176_p6 }
  0x15   :  { %p179_p9 = pnand %p178_p8, %p172_p5 }
  0x17   :  { %182 = shalt.err (!%p179_p9)
}
  0x18   :  { %33 = dma.hbm_to_vmem [thread:$0]  %s227_s1, 256, %s28_s17, [#allocation9], %s198_s12, %s198_s12, %s199_s13  }
  0x19   :  { %191 = dma.done.wait [#allocation6], 256  }
  0x1a   :  { %192 = vsyncadd [#allocation6], 4294967040 }
  0x1b   :  { %193 = dma.done.wait [#allocation9], 256  }
  0x1c   :  { %194 = vsyncadd [#allocation9], 4294967040  ;;  %v49_v0 = vld [vmem:[#allocation8] sm:$0xff]  ;;  %v50_v1 = vld [vmem:[#allocation8 + $0x8] sm:$0xff]  ;;  %s201_s29 = smov [#allocation10]  }
  0x1d   :  { %v47_v2 = vld [vmem:[#allocation5] sm:$0xff]  ;;  %v64_v3 = vmul.f32 %v49_v0, %v49_v0  ;;  %v65_v4 = vmul.f32 %v50_v1, %v50_v1  ;;  %v48_v5 = vld [vmem:[#allocation5 + $0x8] sm:$0xff] }
  0x1e   :  { %v52_v6 = vmul.f32 %v49_v0, %v47_v2  ;;  %v53_v7 = vmul.f32 %v50_v1, %v48_v5  ;;  %v58_v8 = vmul.f32 %v47_v2, %v47_v2  ;;  %v59_v9 = vmul.f32 %v48_v5, %v48_v5 }
  0x1f   :  { %v66_v10 = vadd.f32 %v65_v4, %v64_v3 }
  0x20   :  { %v54_v11 = vadd.f32 %v53_v7, %v52_v6  ;;  %v60_v12 = vadd.f32 %v59_v9, %v58_v8 }
  0x21   :  { %93 = vadd.xlane.f32.xlu1 %v66_v10 }
  0x22   :  { %73 = vadd.xlane.f32.xlu0 %v54_v11 }
  0x26   :  { %83 = vadd.xlane.f32.xlu0 %v60_v12 }
  0xaa   :  { %v94_v13 = vpop.xlane.xlu1 %93 }
  0xab   :  { %v95_v14 = vrot.slane %v94_v13, 4  ;;  %v74_v15 = vpop.xlane.xlu0 %73 }
  0xac   :  { %v75_v16 = vrot.slane %v74_v15, 4 }
  0xad   :  { %v96_v17 = vadd.f32 %v95_v14, %v94_v13 }
  0xae   :  { %v76_v18 = vadd.f32 %v75_v16, %v74_v15 }
  0xaf   :  { %v97_v19 = vrot.slane %v96_v17, 2  ;;  %v84_v20 = vpop.xlane.xlu0 %83 }
  0xb0   :  { %v77_v21 = vrot.slane %v76_v18, 2  ;;  %v85_v22 = vrot.slane %v84_v20, 4 }
  0xb1   :  { %v98_v25 = vadd.f32 %v97_v19, %v96_v17 }
  0xb2   :  { %v86_v23 = vadd.f32 %v85_v22, %v84_v20  ;;  %v78_v24 = vadd.f32 %v77_v21, %v76_v18 }
  0xb3   :  { %v99_v30 = vrot.slane %v98_v25, 1 }
  0xb4   :  { %v87_v26 = vrot.slane %v86_v23, 2  ;;  %v79_v27 = vrot.slane %v78_v24, 1 }
  0xb5   :  { %v100_v33 = vadd.f32 %v99_v30, %v98_v25 }
  0xb6   :  { %v88_v28 = vadd.f32 %v87_v26, %v86_v23  ;;  %v80_v29 = vadd.f32 %v79_v27, %v78_v24 }
  0xb8   :  { %128 = vpush %v80_v29  ;;  %v89_v31 = vrot.slane %v88_v28, 1 }
  0xba   :  { %v90_v32 = vadd.f32 %v89_v31, %v88_v28 }
  0xbc   :  { %130 = vpush %v90_v32 }
  0xbd   :  { %132 = vpush %v100_v33 }
  0xe9   :  { %s129_s0 = spop %128 }
  0xea   :  { %s102_s24 = smul.f32 2.0, %s129_s0 }
  0xec   :  { %s103_s25 = sadd.f32 1.0, %s102_s24 }
  0xed   :  { %s131_s1 = spop %130 }
  0xee   :  { %s133_s21 = spop %132 }
  0xef   :  { %s104_s22 = sadd.f32 %s133_s21, %s131_s1 }
  0xf1   :  { %s105_s23 = sadd.f32 1.0, %s104_s22 }
  0xf3   :  { %v106_v34 = vstv %s105_s23 }
  0xf4   :  { %141 = vrcp.f32 %v106_v34 }
 0x101   :  { %v142_v35 = vpop.eup %141 }
 0x102   :  { %134 = vpush %v142_v35 }
 0x133   :  { %s135_s26 = spop %134 }
 0x134   :  { %s109_s27 = smul.f32 %s135_s26, %s103_s25 }
 0x136   :  { %s110_s28 = ssub.f32 1.0, %s109_s27 }
 0x138   :  { %112 = sst [smem:[#allocation10]] %s110_s28 }
 0x139   :  { %120 = dma.smem_to_hbm %s201_s29, 16, %s228_s2, [#allocation7]  }
 0x13a   :  { %195 = dma.done.wait [#allocation7], 16  }
 0x13b   :  { %196 = vsyncadd [#allocation7], 4294967280 }
 0x13c   :  { %124 = sfence }
 0x13d   :  { %125 = vsyncpa [#allocation6], 1 }
 0x13e   :  { %126 = vsyncpa [#allocation9], 1 }
 0x13f   :  { %127 = vsyncpa [#allocation7], 1 }

</bundles_post_ra>
